<compile_context>
chip_gen: v7x
topology: tpu7x:2x2x1
jax: 0.10.0
libtpu: 0.0.40
codegen_flags: <defaults>
</compile_context>

<pallas_src>
import functools

import jax
import jax.numpy as jnp
from jax.experimental import pallas as pl
from jax.experimental.pallas import tpu as pltpu

num_bond_direction = 3
num_bond_type = 6
num_atom_type = 35
num_chirality_tag = 3


def _round_up(x, m):
    return (x + m - 1) // m * m


def _xavier_uniform(key, shape):
    fan_in, fan_out = shape[0], shape[1]
    bound = (6.0 / (fan_in + fan_out)) ** 0.5
    return jax.random.uniform(key, shape, jnp.float32, -bound, bound)


# ---------------- Pallas kernel: all GraphSAGE layers fused ---------------------------
def fused_gnn_kernel(ahat_ref, h0_ref, b_ref, gamma_ref, beta_ref, out_ref,
                     *, n_valid, num_layer):
    layer = pl.program_id(0)

    # Seed the resident carry (out_ref keeps the same block index for every grid step,
    # so it lives in VMEM across all layers and is written back to HBM only once).
    @pl.when(layer == 0)
    def _():
        out_ref[...] = h0_ref[...]

    h_prev = out_ref[...]  # (Np, Dp) f32 carry

    # mean-aggregate(x_src + edge_emb) == Ahat @ h + b ; bf16 operands, f32 MXU accumulate.
    agg = jnp.dot(ahat_ref[...], h_prev.astype(jnp.bfloat16),
                  preferred_element_type=jnp.float32) + b_ref[0]

    # GraphSAGE.update: F.normalize(aggr_out, p=2, dim=-1) with eps=1e-12
    # (single EUP rsqrt on the clamped squared norm == x / max(||x||, 1e-12)).
    sumsq = jnp.sum(agg * agg, axis=-1, keepdims=True)
    h = agg * jax.lax.rsqrt(jnp.maximum(sumsq, 1e-24))

    # BatchNorm1d, training-mode semantics (batch stats, biased variance, eps=1e-5).
    # Padded rows are masked out of the statistics (they are zero before BN anyway,
    # but (0 - mean)^2 would bias the variance).
    row_ids = jax.lax.broadcasted_iota(jnp.int32, (h.shape[0], 1), 0)
    valid = (row_ids < n_valid).astype(jnp.float32)
    inv_n = jnp.float32(1.0 / n_valid)
    mean = jnp.sum(h * valid, axis=0, keepdims=True) * inv_n
    centered = (h - mean) * valid
    var = jnp.sum(centered * centered, axis=0, keepdims=True) * inv_n
    hn = (h - mean) * jax.lax.rsqrt(var + 1e-5) * gamma_ref[0] + beta_ref[0]

    # F.dropout(drop_ratio=0) is identity; ReLU only on non-final layers.
    hn = jnp.where(layer < num_layer - 1, jnp.maximum(hn, 0.0), hn)

    out_ref[...] = hn


def fused_gnn(ahat_bf16, h0, b, gamma, beta, *, n_valid, num_layer):
    Np, Dp = h0.shape
    L = num_layer
    kern = functools.partial(fused_gnn_kernel, n_valid=n_valid, num_layer=L)
    cost = pl.CostEstimate(
        flops=2 * L * Np * Np * Dp,
        transcendentals=L * (Np + Dp),
        bytes_accessed=Np * Np * 2 + 2 * Np * Dp * 4 + L * (Np * Dp * 4 + 2 * Dp * 4),
    )
    return pl.pallas_call(
        kern,
        out_shape=jax.ShapeDtypeStruct((Np, Dp), jnp.float32),
        grid_spec=pltpu.PrefetchScalarGridSpec(
            num_scalar_prefetch=0,
            grid=(L,),
            in_specs=[
                # Ahat: constant block index -> DMA'd once, resident across all layers.
                pl.BlockSpec((Np, Np), lambda l: (0, 0)),
                # Initial node features (only consumed at layer 0).
                pl.BlockSpec((Np, Dp), lambda l: (0, 0)),
                # Per-layer aggregated edge bias / BN affine, streamed by the layer axis.
                pl.BlockSpec((1, Np, Dp), lambda l: (l, 0, 0)),
                pl.BlockSpec((1, 1, Dp), lambda l: (l, 0, 0)),
                pl.BlockSpec((1, 1, Dp), lambda l: (l, 0, 0)),
            ],
            out_specs=pl.BlockSpec((Np, Dp), lambda l: (0, 0)),
        ),
        compiler_params=pltpu.CompilerParams(
            dimension_semantics=("arbitrary",),   # layers are sequential (h carry)
            vmem_limit_bytes=64 * 1024 * 1024,
        ),
        cost_estimate=cost,
    )(ahat_bf16, h0, b, gamma, beta)


# ---------------- parameter init (mirrors torch __init__ shapes) ----------------------
def init_params(key, num_layer, emb_dim):
    keys = jax.random.split(key, 2 + 2 * num_layer)
    params = {
        "x_emb1": _xavier_uniform(keys[0], (num_atom_type, emb_dim)),
        "x_emb2": _xavier_uniform(keys[1], (num_chirality_tag, emb_dim)),
        "layers": [],
    }
    for l in range(num_layer):
        params["layers"].append(
            {
                "edge_emb1": _xavier_uniform(keys[2 + 2 * l], (num_bond_type, emb_dim)),
                "edge_emb2": _xavier_uniform(keys[3 + 2 * l], (num_bond_direction, emb_dim)),
                "bn_gamma": jnp.ones((1, emb_dim), jnp.float32),
                "bn_beta": jnp.zeros((1, emb_dim), jnp.float32),
            }
        )
    # NOTE: GraphSAGE.linear exists in __init__ but is never used in its forward.
    return params


# ---------------- full GNN forward ----------------------------------------------------
@functools.partial(jax.jit, static_argnames=("num_layer",))
def gnn_forward(params, x_nodes, edge_index, edge_attr, num_layer):
    N = x_nodes.shape[0]
    D = params["x_emb1"].shape[1]

    # node embedding lookup (glue): x = emb1(x[:,0]) + emb2(x[:,1])
    h0 = params["x_emb1"][x_nodes[:, 0]] + params["x_emb2"][x_nodes[:, 1]]

    # add_self_loops + self-loop edge attr (4, 0)
    loop = jnp.arange(N, dtype=edge_index.dtype)
    src = jnp.concatenate([edge_index[0], loop])
    dst = jnp.concatenate([edge_index[1], loop])
    self_loop_attr = jnp.concatenate(
        [jnp.full((N, 1), 4, edge_attr.dtype), jnp.zeros((N, 1), edge_attr.dtype)], axis=1
    )
    eattr = jnp.concatenate([edge_attr, self_loop_attr], axis=0)

    # lane/sublane-friendly padded sizes
    Np = _round_up(N, 8)
    Dp = _round_up(D, 128)

    # dense mean-aggregation operator via O(E) scatter-add (no (N,E) one-hots):
    deg = jnp.zeros((N,), jnp.float32).at[dst].add(1.0)   # deg >= 1 thanks to self loops
    w = 1.0 / deg[dst]                                    # per-edge mean weight
    ahat = jnp.zeros((Np, Np), jnp.float32).at[dst, src].add(w)
    ahat_bf16 = ahat.astype(jnp.bfloat16)

    # per-layer aggregated edge bias b_l = segment-mean(edge_emb_l, dst), stacked (L, Np, Dp)
    b_list, g_list, be_list = [], [], []
    for l in range(num_layer):
        lp = params["layers"][l]
        edge_emb = lp["edge_emb1"][eattr[:, 0]] + lp["edge_emb2"][eattr[:, 1]]   # (E_tot, D)
        b_l = jnp.zeros((Np, D), jnp.float32).at[dst].add(w[:, None] * edge_emb)
        b_list.append(b_l)
        g_list.append(lp["bn_gamma"])
        be_list.append(lp["bn_beta"])
    b = jnp.pad(jnp.stack(b_list), ((0, 0), (0, 0), (0, Dp - D)))
    gamma = jnp.pad(jnp.stack(g_list), ((0, 0), (0, 0), (0, Dp - D)), constant_values=1.0)
    beta = jnp.pad(jnp.stack(be_list), ((0, 0), (0, 0), (0, Dp - D)))

    h0p = jnp.pad(h0, ((0, Np - N), (0, Dp - D)))

    out = fused_gnn(ahat_bf16, h0p, b, gamma, beta, n_valid=N, num_layer=num_layer)
    return out[:N, :D]  # JK='last'; dropout(drop_ratio=0) is identity


# ---------------- pure-JAX f32 reference (for tolerance check) ------------------------
def gnn_reference(params, x_nodes, edge_index, edge_attr, num_layer):
    N = x_nodes.shape[0]
    h = params["x_emb1"][x_nodes[:, 0]] + params["x_emb2"][x_nodes[:, 1]]
    loop = jnp.arange(N, dtype=edge_index.dtype)
    src = jnp.concatenate([edge_index[0], loop])
    dst = jnp.concatenate([edge_index[1], loop])
    self_loop_attr = jnp.concatenate(
        [jnp.full((N, 1), 4, edge_attr.dtype), jnp.zeros((N, 1), edge_attr.dtype)], axis=1
    )
    eattr = jnp.concatenate([edge_attr, self_loop_attr], axis=0)
    deg = jnp.zeros((N,), jnp.float32).at[dst].add(1.0)
    for l in range(num_layer):
        lp = params["layers"][l]
        ee = lp["edge_emb1"][eattr[:, 0]] + lp["edge_emb2"][eattr[:, 1]]
        msg = h[src] + ee
        agg = jnp.zeros((N, h.shape[1]), jnp.float32).at[dst].add(msg) / deg[:, None]
        nrm = jnp.sqrt(jnp.sum(agg * agg, axis=-1, keepdims=True))
        hn = agg / jnp.maximum(nrm, 1e-12)
        mean = hn.mean(0, keepdims=True)
        var = ((hn - mean) ** 2).mean(0, keepdims=True)
        hb = (hn - mean) * jax.lax.rsqrt(var + 1e-5) * lp["bn_gamma"] + lp["bn_beta"]
        h = jnp.maximum(hb, 0.0) if l != num_layer - 1 else hb
    return h


if __name__ == "__main__":
    key = jax.random.PRNGKey(0)
    k1, k2, k3, k4, k5, kp = jax.random.split(key, 6)

    N, E, emb_dim, num_layer = 16, 24, 32, 2
    x_nodes = jnp.stack(
        [
            jax.random.randint(k1, (N,), 0, num_atom_type),
            jax.random.randint(k2, (N,), 0, num_chirality_tag),
        ],
        axis=1,
    )
    edge_index = jax.random.randint(k3, (2, E), 0, N)
    edge_attr = jnp.stack(
        [
            jax.random.randint(k4, (E,), 0, num_bond_type),
            jax.random.randint(k5, (E,), 0, num_bond_direction),
        ],
        axis=1,
    )

    params = init_params(kp, num_layer, emb_dim)
    out = gnn_forward(params, x_nodes, edge_index, edge_attr, num_layer)
    out = jax.block_until_ready(out)

    assert out.shape == (N, emb_dim) and out.dtype == jnp.float32
    assert bool(jnp.all(jnp.isfinite(out)))

    ref = gnn_reference(params, x_nodes, edge_index, edge_attr, num_layer)
    max_err = float(jnp.max(jnp.abs(out - ref)))
    # bf16 Ahat / h matmul operands introduce small deviations vs. the f32 reference.
    assert max_err < 0.15, f"max abs error vs reference too large: {max_err}"

    print("KERNEL_OK")
</pallas_src>

<mosaic_0001>
module attributes {stable_mosaic.version = 11 : i64} {
  func.func @fused_gnn_kernel(%arg0: i32, %arg1: memref<16x16xbf16, #tpu.memory_space<vmem>>, %arg2: memref<16x128xf32, #tpu.memory_space<vmem>>, %arg3: memref<1x16x128xf32, #tpu.memory_space<vmem>>, %arg4: memref<1x1x128xf32, #tpu.memory_space<vmem>>, %arg5: memref<1x1x128xf32, #tpu.memory_space<vmem>>, %arg6: memref<16x128xf32, #tpu.memory_space<vmem>>) attributes {dimension_semantics = [#tpu.dimension_semantics<arbitrary>], iteration_bounds = array<i64: 2>, scalar_prefetch = 0 : i64, scratch_operands = 0 : i64, tpu.core_type = #tpu.core_type<tc>, window_params = [{pipeline_mode = #tpu.pipeline_mode<synchronous>, transform_indices = @transform_0, window_bounds = array<i64: 16, 16>}, {pipeline_mode = #tpu.pipeline_mode<synchronous>, transform_indices = @transform_1, window_bounds = array<i64: 16, 128>}, {transform_indices = @transform_2, window_bounds = array<i64: 1, 16, 128>}, {transform_indices = @transform_3, window_bounds = array<i64: 1, 1, 128>}, {transform_indices = @transform_4, window_bounds = array<i64: 1, 1, 128>}, {pipeline_mode = #tpu.pipeline_mode<synchronous>, transform_indices = @transform_5, window_bounds = array<i64: 16, 128>}]} {
    %c0_i32 = arith.constant 0 : i32
    %0 = arith.cmpi eq, %arg0, %c0_i32 : i32
    %1 = arith.extui %0 : i1 to i32
    %c0_i32_0 = arith.constant 0 : i32
    %2 = arith.cmpi ne, %1, %c0_i32_0 : i32
    scf.if %2 {
      %c0_23 = arith.constant 0 : index
      %c0_24 = arith.constant 0 : index
      %58 = vector.load %arg2[%c0_23, %c0_24] : memref<16x128xf32, #tpu.memory_space<vmem>>, vector<16x128xf32>
      %c0_25 = arith.constant 0 : index
      %c0_26 = arith.constant 0 : index
      %59 = vector.load %arg6[%c0_25, %c0_26] : memref<16x128xf32, #tpu.memory_space<vmem>>, vector<16x128xf32>
      tpu.vector_store %arg6[%c0_25, %c0_26], %58 {strides = array<i32>} : memref<16x128xf32, #tpu.memory_space<vmem>>, vector<16x128xf32>,
    } else {
    }
    %c0 = arith.constant 0 : index
    %c0_1 = arith.constant 0 : index
    %3 = vector.load %arg6[%c0, %c0_1] : memref<16x128xf32, #tpu.memory_space<vmem>>, vector<16x128xf32>
    %c0_2 = arith.constant 0 : index
    %c0_3 = arith.constant 0 : index
    %4 = vector.load %arg1[%c0_2, %c0_3] : memref<16x16xbf16, #tpu.memory_space<vmem>>, vector<16x16xbf16>
    %5 = arith.truncf %3 : vector<16x128xf32> to vector<16x128xbf16>
    %cst = arith.constant dense<0.000000e+00> : vector<16x128xf32>
    %6 = tpu.matmul %4, %5, %cst {dimension_numbers = #tpu.dot_dimension_numbers<[1], [0], [0], [1], [0, 0, 1, 1], [], []>} : vector<16x16xbf16>, vector<16x128xbf16>, vector<16x128xf32> -> vector<16x128xf32>
    %c0_4 = arith.constant 0 : index
    %c0_5 = arith.constant 0 : index
    %c0_6 = arith.constant 0 : index
    %7 = vector.load %arg3[%c0_4, %c0_5, %c0_6] : memref<1x16x128xf32, #tpu.memory_space<vmem>>, vector<1x16x128xf32>
    %8 = vector.shape_cast %7 : vector<1x16x128xf32> to vector<16x128xf32>
    %9 = arith.addf %6, %8 : vector<16x128xf32>
    %10 = arith.mulf %9, %9 : vector<16x128xf32>
    %cst_7 = arith.constant dense<0.000000e+00> : vector<16xf32>
    %11 = vector.multi_reduction <add>, %10, %cst_7 [1] : vector<16x128xf32> to vector<16xf32>
    %12 = vector.shape_cast %11 : vector<16xf32> to vector<16x1xf32>
    %cst_8 = arith.constant 1.000000e-24 : f32
    %13 = vector.broadcast %cst_8 : f32 to vector<16x1xf32>
    %14 = arith.maximumf %12, %13 : vector<16x1xf32>
    %15 = math.rsqrt %14 : vector<16x1xf32>
    %16 = vector.broadcast %15 : vector<16x1xf32> to vector<16x128xf32>
    %17 = arith.mulf %9, %16 : vector<16x128xf32>
    %18 = tpu.iota {dimensions = array<i32: 0>} : vector<16x1xi32>
    %c16_i32 = arith.constant 16 : i32
    %19 = vector.broadcast %c16_i32 : i32 to vector<16x1xi32>
    %20 = arith.cmpi slt, %18, %19 : vector<16x1xi32>
    %21 = arith.extui %20 : vector<16x1xi1> to vector<16x1xi32>
    %22 = arith.sitofp %21 : vector<16x1xi32> to vector<16x1xf32>
    %23 = vector.broadcast %22 : vector<16x1xf32> to vector<16x128xf32>
    %24 = arith.mulf %17, %23 : vector<16x128xf32>
    %cst_9 = arith.constant dense<0.000000e+00> : vector<128xf32>
    %25 = vector.multi_reduction <add>, %24, %cst_9 [0] : vector<16x128xf32> to vector<128xf32>
    %26 = vector.shape_cast %25 : vector<128xf32> to vector<1x128xf32>
    %cst_10 = arith.constant 6.250000e-02 : f32
    %27 = vector.broadcast %cst_10 : f32 to vector<1x128xf32>
    %28 = arith.mulf %26, %27 : vector<1x128xf32>
    %29 = vector.broadcast %28 : vector<1x128xf32> to vector<16x128xf32>
    %30 = arith.subf %17, %29 : vector<16x128xf32>
    %31 = vector.broadcast %22 : vector<16x1xf32> to vector<16x128xf32>
    %32 = arith.mulf %30, %31 : vector<16x128xf32>
    %33 = arith.mulf %32, %32 : vector<16x128xf32>
    %cst_11 = arith.constant dense<0.000000e+00> : vector<128xf32>
    %34 = vector.multi_reduction <add>, %33, %cst_11 [0] : vector<16x128xf32> to vector<128xf32>
    %35 = vector.shape_cast %34 : vector<128xf32> to vector<1x128xf32>
    %cst_12 = arith.constant 6.250000e-02 : f32
    %36 = vector.broadcast %cst_12 : f32 to vector<1x128xf32>
    %37 = arith.mulf %35, %36 : vector<1x128xf32>
    %38 = vector.broadcast %28 : vector<1x128xf32> to vector<16x128xf32>
    %39 = arith.subf %17, %38 : vector<16x128xf32>
    %cst_13 = arith.constant 9.99999974E-6 : f32
    %40 = vector.broadcast %cst_13 : f32 to vector<1x128xf32>
    %41 = arith.addf %37, %40 : vector<1x128xf32>
    %42 = math.rsqrt %41 : vector<1x128xf32>
    %43 = vector.broadcast %42 : vector<1x128xf32> to vector<16x128xf32>
    %44 = arith.mulf %39, %43 : vector<16x128xf32>
    %c0_14 = arith.constant 0 : index
    %c0_15 = arith.constant 0 : index
    %c0_16 = arith.constant 0 : index
    %45 = vector.load %arg4[%c0_14, %c0_15, %c0_16] : memref<1x1x128xf32, #tpu.memory_space<vmem>>, vector<1x1x128xf32>
    %46 = vector.shape_cast %45 : vector<1x1x128xf32> to vector<1x128xf32>
    %47 = vector.broadcast %46 : vector<1x128xf32> to vector<16x128xf32>
    %48 = arith.mulf %44, %47 : vector<16x128xf32>
    %c0_17 = arith.constant 0 : index
    %c0_18 = arith.constant 0 : index
    %c0_19 = arith.constant 0 : index
    %49 = vector.load %arg5[%c0_17, %c0_18, %c0_19] : memref<1x1x128xf32, #tpu.memory_space<vmem>>, vector<1x1x128xf32>
    %50 = vector.shape_cast %49 : vector<1x1x128xf32> to vector<1x128xf32>
    %51 = vector.broadcast %50 : vector<1x128xf32> to vector<16x128xf32>
    %52 = arith.addf %48, %51 : vector<16x128xf32>
    %c1_i32 = arith.constant 1 : i32
    %53 = arith.cmpi slt, %arg0, %c1_i32 : i32
    %cst_20 = arith.constant 0.000000e+00 : f32
    %54 = vector.broadcast %cst_20 : f32 to vector<16x128xf32>
    %55 = arith.maximumf %52, %54 : vector<16x128xf32>
    %56 = arith.select %53, %55, %52 : vector<16x128xf32>
    %c0_21 = arith.constant 0 : index
    %c0_22 = arith.constant 0 : index
    %57 = vector.load %arg6[%c0_21, %c0_22] : memref<16x128xf32, #tpu.memory_space<vmem>>, vector<16x128xf32>
    tpu.vector_store %arg6[%c0_21, %c0_22], %56 {strides = array<i32>} : memref<16x128xf32, #tpu.memory_space<vmem>>, vector<16x128xf32>,
    return
  }
  func.func @transform_0(%arg0: i32) -> (i32, i32) {
    %c0_i32 = arith.constant 0 : i32
    %c0_i32_0 = arith.constant 0 : i32
    %c0_i32_1 = arith.constant 0 : i32
    return %c0_i32, %c0_i32_0 : i32, i32
  }
  func.func @transform_1(%arg0: i32) -> (i32, i32) {
    %c0_i32 = arith.constant 0 : i32
    %c0_i32_0 = arith.constant 0 : i32
    %c0_i32_1 = arith.constant 0 : i32
    return %c0_i32, %c0_i32_0 : i32, i32
  }
  func.func @transform_2(%arg0: i32) -> (i32, i32, i32) {
    %c0_i32 = arith.constant 0 : i32
    %c0_i32_0 = arith.constant 0 : i32
    %c0_i32_1 = arith.constant 0 : i32
    return %arg0, %c0_i32, %c0_i32_0 : i32, i32, i32
  }
  func.func @transform_3(%arg0: i32) -> (i32, i32, i32) {
    %c0_i32 = arith.constant 0 : i32
    %c0_i32_0 = arith.constant 0 : i32
    %c0_i32_1 = arith.constant 0 : i32
    return %arg0, %c0_i32, %c0_i32_0 : i32, i32, i32
  }
  func.func @transform_4(%arg0: i32) -> (i32, i32, i32) {
    %c0_i32 = arith.constant 0 : i32
    %c0_i32_0 = arith.constant 0 : i32
    %c0_i32_1 = arith.constant 0 : i32
    return %arg0, %c0_i32, %c0_i32_0 : i32, i32, i32
  }
  func.func @transform_5(%arg0: i32) -> (i32, i32) {
    %c0_i32 = arith.constant 0 : i32
    %c0_i32_0 = arith.constant 0 : i32
    %c0_i32_1 = arith.constant 0 : i32
    return %c0_i32, %c0_i32_0 : i32, i32
  }
}

</mosaic_0001>

<bundles_post_ra>
// kernel: gnn_forward.1
= control target key start
LH: loop header
LB: loop body
LE: loop exit
PB: predicated region body
PF: predicated region fallthrough
CT: control target
= control target key end

     0   :  { %s1238_s0 = inlined_call_operand.hbm [shape: bf16[16,16], index: 0, kind: input, shape index: {}]   ;;  %s1239_s1 = inlined_call_operand.hbm [shape: f32[16,128], index: 1, kind: input, shape index: {}]   ;;  %s1240_s2 = inlined_call_operand.hbm [shape: f32[2,16,128], index: 2, kind: input, shape index: {}]   ;;  %s1241_s3 = inlined_call_operand.hbm [shape: f32[2,1,128], index: 3, kind: input, shape index: {}]   ;;  %s1242_s4 = inlined_call_operand.hbm [shape: f32[2,1,128], index: 4, kind: input, shape index: {}]   ;;  %s1243_s5 = inlined_call_operand.hbm [shape: f32[16,128], index: 5, kind: output, shape index: {}]  }
   0x1   :  { %1256 = sst [smem:[#allocation15_spill]] %s1238_s0 }
   0x2   :  { %10 = vsyncpa [#allocation3], 0 }
   0x3   :  { %11 = vsyncpa [#allocation6], 0 }
   0x4   :  { %12 = vsyncpa [#allocation4], 0  ;;  %s963_s18 = smov 0   ;;  %s965_s19 = smov 0  }
   0x5   :  { %s967_s20 = smov 0   ;;  %s969_s21 = smov 0  }
   0x6 LB: > { %s982_s22 = sadd.s32 4294967295, %s917_s21   ;;  %s985_s23 = sadd.s32 1, %s917_s21   ;;  %s917_s21 = sphi %s969_s21, %s1283_s21   ;;  %s913_s20 = sphi %s967_s20, %s1282_s20   ;;  %s909_s19 = sphi %s965_s19, %s1281_s19   ;;  %s905_s18 = sphi %s963_s18, %s1280_s18  }
   0x7   : > { %s64_s24 = ssub.s32 %s917_s21, %s985_s23  ;;  %s67_s25 = sadd.s32 1, %s913_s20 }
   0x8   : > { %p65_p0 = scmp.eq.s32.totalorder %s64_s24, 0  ;;  %p74_p1 = scmp.ne.s32.totalorder %s913_s20, %s909_s19 }
   0x9   : > { %p75_p2 = scmp.eq.s32.totalorder %s917_s21, 0  ;;  %p80_p3 = scmp.ne.s32.totalorder %s909_s19, %s905_s18 }
   0xa   : > { %s995_s26 = scalar_select %p65_p0, %s913_s20, %s67_s25  }
   0xb   : > { %p997_p4 = por %p75_p2, %p74_p1  ;;  %p1244_p5 = scmp.eq.s32.totalorder %s982_s22, 0 }
   0xc   : > { %p576_p6 = scmp.ge.s32.totalorder %s917_s21, 1  ;;  %p164_p7 = scmp.lt.s32.totalorder %s917_s21, 3 }
   0xd   : > { %p1006_p8 = por %p1244_p5, %p80_p3  ;;  %s919_s30 = smov [#allocation2]  }
   0xe   : > { %p1011_p10 = pnand %p576_p6, %p164_p7  ;;  %s176_s6 = sshll.u32 %s919_s30, 4  ;;  %s177_s6 = int_to_ptr.vmem [resolvable:$true] %s176_s6 }
   0xf   : > { %s1258_s28 = scalar_select %p1006_p8, 1, 0 }
  0x10   : > { %s1259_s29 = scalar_select %p1011_p10, 1, 0 }
  0x11   : > { %p625_p11 = pneg %p1011_p10  ;;  %p644_p13 = scmp.lt.s32.totalorder %s917_s21, 2 }
  0x12   : > { %s1262_s0 = sld [smem:[#allocation15_spill]] }
  0x13   : > { %p1019_p12 = pnand %p625_p11, %p1244_p5  ;;  %p1026_p0 = pnand %p644_p13, %p997_p4 }
  0x15   : > { %s1260_s7 = scalar_select %p1019_p12, 1, 0 }
  0x16   : > { %s1261_s8 = scalar_select %p1026_p0, 1, 0 }
  0x17   : > { %p1248_p2 = pneg %p1019_p12 }
  0x18   : > { %s699_s11 = scalar_lea.hbm %s1262_s0, 128 }
  0x19   : > { %p700_p1 = scmp.ne.s32.totalorder %s1262_s0, %s699_s11  ;;  %p706_p4 = scmp.lt.u32.totalorder %s699_s11, %s1262_s0 }
  0x1b   : > { %p702_p3 = pnand %p1248_p2, %p700_p1 }
  0x1d   : > { %p703_p6 = pneg %p702_p3 }
  0x1f   : > { %p708_p7 = pnand %p706_p4, %p703_p6 }
  0x21   : > { %711 = shalt.err (!%p708_p7)
}
  0x22   : > { %s712_s16 = scalar_lea.vmem %s177_s6, 128  ;;  %p720_p5 = scmp.lt.s32.totalorder %s177_s6, %s177_s6 }
  0x23   : > { %p713_p11 = scmp.ne.s32.totalorder %s177_s6, %s712_s16  ;;  %p721_p8 = scmp.lt.s32.totalorder %s712_s16, %s712_s16 }
  0x25   : > { %p715_p13 = pnand %p713_p11, %p1248_p2  ;;  %p722_p10 = por %p721_p8, %p720_p5 }
  0x27   : > { %p716_p9 = pneg %p715_p13 }
  0x29   : > { %p723_p0 = pnand %p722_p10, %p716_p9 }
  0x2b   : > { %726 = shalt.err (!%p723_p0)
}
  0x2c   : > { %s920_s17 = smov 64   ;;  %s921_s18 = smov 4  }
  0x2d   : > { %628 = dma.hbm_to_vmem [thread:$0]  (!%p1019_p12), %s1262_s0, 128, %s177_s6, [#allocation3], %s920_s17, %s920_s17, %s921_s18  }
  0x2e   : > { %s203_s27 = sand.u32 1, %s917_s21   ;;  %s1054_s30 = sand.u32 1, %s913_s20  }
  0x2f   : > { %s580_s9 = sshll.u32 %s1054_s30, 4  ;;  %s598_s10 = sshll.u32 %s917_s21, 8 }
  0x30   : > { %s1061_s13 = scalar_lea.hbm %s1240_s2, %s598_s10  ;;  %s207_s14 = scalar_lea.vmem [#allocation7], %s580_s9 }
  0x31   : > { %s214_s15 = sshll.u32 %s207_s14, 4  ;;  %s583_s6 = sshll.u32 %s917_s21, 4  ;;  %s1063_s15 = int_to_ptr.vmem [resolvable:$true] %s214_s15 }
  0x32   : > { %s1066_s16 = scalar_lea.sflag [#allocation3], %s203_s27  ;;  %s727_s17 = scalar_lea.hbm %s1061_s13, 256 }
  0x33   : > { %p728_p5 = scmp.ne.s32.totalorder %s1061_s13, %s727_s17  ;;  %p1263_p8 = scmp.ne.s32.totalorder %s1261_s8, 0 }
  0x34   : > { %s732_s9 = scalar_lea.hbm %s1240_s2, 512  ;;  %p733_p1 = scmp.lt.u32.totalorder %s1061_s13, %s1240_s2 }
  0x35   : > { %p1072_p9 = pneg %p1263_p8  ;;  %p734_p3 = scmp.lt.u32.totalorder %s732_s9, %s727_s17 }
  0x36   : > { %p736_p4 = scmp.lt.u32.totalorder %s727_s17, %s1061_s13 }
  0x37   : > { %s1264_s18 = scalar_select %p1072_p9, 1, 0 }
  0x38   : > { %p730_p10 = pnand %p1072_p9, %p728_p5  ;;  %p735_p6 = por %p734_p3, %p733_p1 }
  0x3a   : > { %p731_p0 = pneg %p730_p10  ;;  %p737_p7 = por %p736_p4, %p735_p6 }
  0x3c   : > { %p738_p11 = pnand %p737_p7, %p731_p0 }
  0x3e   : > { %741 = shalt.err (!%p738_p11)
}
  0x3f   : > { %s742_s27 = scalar_lea.vmem %s1063_s15, 256  ;;  %s922_s12 = smov [#allocation7]  }
  0x40   : > { %p743_p13 = scmp.ne.s32.totalorder %s1063_s15, %s742_s27  ;;  %s747_s14 = sshll.u32 %s922_s12, 4  ;;  %s748_s14 = int_to_ptr.vmem [resolvable:$false] %s747_s14 }
  0x41   : > { %s749_s24 = scalar_lea.vmem %s748_s14, 512  ;;  %p750_p2 = scmp.lt.s32.totalorder %s1063_s15, %s748_s14 }
  0x42   : > { %p745_p5 = pnand %p743_p13, %p1072_p9  ;;  %p751_p12 = scmp.lt.s32.totalorder %s749_s24, %s742_s27 }
  0x44   : > { %p746_p10 = pneg %p745_p5  ;;  %p752_p1 = por %p751_p12, %p750_p2 }
  0x46   : > { %p753_p3 = pnand %p752_p1, %p746_p10 }
  0x48   : > { %756 = shalt.err (!%p753_p3)
}
  0x49   : > { %s1251_s17 = smov 128   ;;  %s1252_s25 = smov 8  }
  0x4a   : > { %635 = dma.hbm_to_vmem [thread:$0]  (!%p1263_p8), %s1061_s13, 256, %s1063_s15, %s1066_s16, %s1251_s17, %s1251_s17, %s1252_s25  }
  0x4b   : > { %s1104_s11 = scalar_lea.hbm %s1241_s3, %s583_s6  ;;  %s227_s27 = scalar_lea.vmem [#allocation8], %s1054_s30 }
  0x4c   : > { %s234_s12 = sshll.u32 %s227_s27, 4  ;;  %s757_s14 = scalar_lea.hbm %s1104_s11, 16  ;;  %s235_s12 = int_to_ptr.vmem [resolvable:$true] %s234_s12 }
  0x4d   : > { %p758_p12 = scmp.ne.s32.totalorder %s1104_s11, %s757_s14  ;;  %s762_s15 = scalar_lea.hbm %s1241_s3, 32 }
  0x4e   : > { %p763_p6 = scmp.lt.u32.totalorder %s1104_s11, %s1241_s3  ;;  %p764_p4 = scmp.lt.u32.totalorder %s762_s15, %s757_s14 }
  0x4f   : > { %p760_p2 = pnand %p758_p12, %p1072_p9  ;;  %p766_p11 = scmp.lt.u32.totalorder %s757_s14, %s1104_s11 }
  0x50   : > { %p765_p7 = por %p764_p4, %p763_p6 }
  0x51   : > { %p761_p0 = pneg %p760_p2 }
  0x52   : > { %p767_p13 = por %p766_p11, %p765_p7 }
  0x54   : > { %p768_p5 = pnand %p767_p13, %p761_p0 }
  0x56   : > { %771 = shalt.err (!%p768_p5)
}
  0x57   : > { %s772_s10 = scalar_lea.vmem %s235_s12, 16  ;;  %s925_s27 = smov [#allocation8]  }
  0x58   : > { %p773_p10 = scmp.ne.s32.totalorder %s235_s12, %s772_s10  ;;  %s777_s25 = sshll.u32 %s925_s27, 4  ;;  %s778_s25 = int_to_ptr.vmem [resolvable:$false] %s777_s25 }
  0x59   : > { %s779_s24 = scalar_lea.vmem %s778_s25, 32  ;;  %p780_p12 = scmp.lt.s32.totalorder %s235_s12, %s778_s25 }
  0x5a   : > { %p775_p1 = pnand %p773_p10, %p1072_p9  ;;  %p781_p2 = scmp.lt.s32.totalorder %s779_s24, %s772_s10 }
  0x5c   : > { %p776_p3 = pneg %p775_p1  ;;  %p782_p8 = por %p781_p2, %p780_p12 }
  0x5e   : > { %p783_p4 = pnand %p782_p8, %p776_p3 }
  0x60   : > { %786 = shalt.err (!%p783_p4)
}
  0x61   : > { %p1265_p6 = scmp.ne.s32.totalorder %s1261_s8, 0  ;;  %s926_s17 = smov [#allocation5]  }
  0x62   : > { %s189_s14 = sshll.u32 %s926_s17, 4  ;;  %s1130_s9 = scalar_lea.hbm %s1242_s4, %s583_s6  ;;  %s190_s14 = int_to_ptr.vmem [resolvable:$true] %s189_s14 }
  0x63   : > { %638 = dma.hbm_to_vmem [thread:$0]  (!%p1265_p6), %s1104_s11, 16, %s235_s12, %s1066_s16  }
  0x64   : > { %s787_s27 = scalar_lea.hbm %s1239_s1, 256  ;;  %p1266_p0 = scmp.ne.s32.totalorder %s1260_s7, 0 }
  0x65   : > { %p788_p8 = scmp.ne.s32.totalorder %s1239_s1, %s787_s27  ;;  %p794_p5 = scmp.lt.u32.totalorder %s787_s27, %s1239_s1 }
  0x66   : > { %p1267_p7 = pneg %p1266_p0 }
  0x68   : > { %p790_p11 = pnand %p788_p8, %p1267_p7 }
  0x6a   : > { %p791_p13 = pneg %p790_p11 }
  0x6c   : > { %p796_p10 = pnand %p794_p5, %p791_p13 }
  0x6e   : > { %799 = shalt.err (!%p796_p10)
}
  0x6f   : > { %s800_s21 = scalar_lea.vmem %s190_s14, 256  ;;  %p1268_p3 = pmov %p1267_p7 }
  0x70   : > { %p801_p1 = scmp.ne.s32.totalorder %s190_s14, %s800_s21  ;;  %p808_p4 = scmp.lt.s32.totalorder %s190_s14, %s190_s14 }
  0x71   : > { %p809_p6 = scmp.lt.s32.totalorder %s800_s21, %s800_s21 }
  0x72   : > { %p803_p12 = pnand %p801_p1, %p1268_p3 }
  0x73   : > { %p810_p9 = por %p809_p6, %p808_p4 }
  0x74   : > { %p804_p2 = pneg %p803_p12 }
  0x76   : > { %p811_p7 = pnand %p810_p9, %p804_p2 }
  0x78   : > { %814 = shalt.err (!%p811_p7)
}
  0x79   : > { %s1269_s0 = smov 8   ;;  %s1270_s6 = smov 128  }
  0x7a   : > { %631 = dma.hbm_to_vmem [thread:$0]  (!%p1266_p0), %s1239_s1, 256, %s190_s14, [#allocation6], %s1270_s6, %s1270_s6, %s1269_s0  }
  0x7b   : > { %s244_s15 = scalar_lea.vmem [#allocation9], %s1054_s30  ;;  %s815_s10 = scalar_lea.hbm %s1130_s9, 16 }
  0x7c   : > { %s251_s25 = sshll.u32 %s244_s15, 4  ;;  %p816_p9 = scmp.ne.s32.totalorder %s1130_s9, %s815_s10  ;;  %s252_s25 = int_to_ptr.vmem [resolvable:$true] %s251_s25 }
  0x7d   : > { %p1271_p6 = scmp.ne.s32.totalorder %s1264_s18, 0  ;;  %s820_s24 = scalar_lea.hbm %s1242_s4, 32 }
  0x7e   : > { %p821_p13 = scmp.lt.u32.totalorder %s1130_s9, %s1242_s4  ;;  %p822_p5 = scmp.lt.u32.totalorder %s820_s24, %s815_s10 }
  0x7f   : > { %p818_p8 = pnand %p816_p9, %p1271_p6  ;;  %p824_p1 = scmp.lt.u32.totalorder %s815_s10, %s1130_s9 }
  0x80   : > { %p823_p10 = por %p822_p5, %p821_p13 }
  0x81   : > { %p819_p11 = pneg %p818_p8 }
  0x82   : > { %p825_p0 = por %p824_p1, %p823_p10 }
  0x84   : > { %p826_p3 = pnand %p825_p0, %p819_p11 }
  0x86   : > { %829 = shalt.err (!%p826_p3)
}
  0x87   : > { %s830_s30 = scalar_lea.vmem %s252_s25, 16  ;;  %s927_s14 = smov [#allocation9]  }
  0x88   : > { %p831_p12 = scmp.ne.s32.totalorder %s252_s25, %s830_s30  ;;  %s835_s21 = sshll.u32 %s927_s14, 4  ;;  %s836_s21 = int_to_ptr.vmem [resolvable:$false] %s835_s21 }
  0x89   : > { %s837_s0 = scalar_lea.vmem %s836_s21, 32  ;;  %p838_p7 = scmp.lt.s32.totalorder %s252_s25, %s836_s21 }
  0x8a   : > { %p833_p2 = pnand %p831_p12, %p1271_p6  ;;  %p839_p9 = scmp.lt.s32.totalorder %s837_s0, %s830_s30 }
  0x8c   : > { %p834_p4 = pneg %p833_p2  ;;  %p840_p8 = por %p839_p9, %p838_p7 }
  0x8e   : > { %p841_p5 = pnand %p840_p8, %p834_p4 }
  0x90   : > { %844 = shalt.err (!%p841_p5)
}
  0x91   : > { %p1272_p13 = scmp.ne.s32.totalorder %s1261_s8, 0  ;;  %p1273_p11 = scmp.ne.s32.totalorder %s1259_s29, 0 }
  0x92   : > { %p1274_p6 = scmp.eq.s32.totalorder (!%p1273_p11), %s982_s22, 0 }
  0x93   : > { %641 = dma.hbm_to_vmem [thread:$0]  (!%p1272_p13), %s1130_s9, 16, %s252_s25, %s1066_s16  }
  0x94   : > { %260 = sbr.rel (%p1273_p11) target bundleno = 631 (0x277), region = 40 }
  0x9b   : > { %888 = dma.done.wait (%p1274_p6), [#allocation3], 128   ;;  %p1275_p10 = pmov %p1274_p6 }
  0x9c   : > { %p1276_p1 = pmov %p1274_p6 }
  0x9d   : > { %890 = vsyncadd (%p1275_p10), [#allocation3], 4294967168 }
  0x9e   : > { %892 = dma.done.wait (%p1276_p1), [#allocation6], 256   ;;  %p1277_p0 = pmov %p1276_p1 }
  0x9f   : > { %s270_s8 = sand.u32 1, %s982_s22   ;;  %s1186_s16 = sand.u32 1, %s909_s19  }
  0xa0   : > { %894 = vsyncadd (%p1277_p0), [#allocation6], 4294967040  ;;  %s588_s29 = sshll.u32 %s1186_s16, 4  ;;  %s271_s18 = scalar_lea.sflag [#allocation3], %s270_s8 }
  0xa1   : > { %s274_s9 = scalar_lea.vmem [#allocation7], %s588_s29  ;;  %p1278_p3 = scmp.ne.s32.totalorder %s1258_s28, 0 }
  0xa3   : > { %896 = dma.done.wait (%p1278_p3), %s271_s18, 288  }
  0xa4   : > { %898 = vsyncadd (%p1278_p3), %s271_s18, 4294967008  ;;  %s282_s6 = scalar_lea.vmem [#allocation8], %s1186_s16  ;;  %s290_s17 = scalar_lea.vmem [#allocation9], %s1186_s16 }
  0xa5   : > { %p1279_p12 = scmp.ne.s32.totalorder %s982_s22, 0 }
  0xa6   : > { %v325_v0 = vld [vmem:[#allocation5] sm:$0xff] (!%p1279_p12)  ;;  %v326_v1 = vld [vmem:[#allocation5 + $0x8] sm:$0xff] (!%p1279_p12) }
  0xa7   : > { %324 = sbr.rel (%p1279_p12) target bundleno = 174 (0xae), region = 64  ;;  %327 = vst [vmem:[#allocation10] sm:$0xff] (!%p1279_p12), %v325_v0  ;;  %328 = vst [vmem:[#allocation10 + $0x8] sm:$0xff] (!%p1279_p12), %v326_v1 }
  0xae PF: > { %v329_v2 = vld [vmem:[#allocation10] sm:$0xff]  ;;  %v330_v3 = vld [vmem:[#allocation10 + $0x8] sm:$0xff]  ;;  %v928_v4 = vmov 0.0   ;;  %vm929_vm0 = vmmov 0   ;;  %vm341_vm1 = vcmask 130048   ;;  %p453_p2 = scmp.lt.s32.totalorder %s982_s22, 1 }
  0xaf   : > { %601 = vmatprep.subr.bf16.mxu0 %v928_v4  ;;  %v333_v5 = vpack.c.bf16 %v330_v3, %v329_v2  ;;  %603 = vmatprep.mubr.msk.bf16.mxu0 %vm929_vm0, %v928_v4  ;;  %v692_v6 = vld [vmem:[#allocation2] sm:$0xff]   ;;  %v334_v7 = vld [vmem:[%s274_s9] sm:$0xff]  ;;  %s930_s13 = smov [#allocation10]   ;;  %p647_p4 = scmp.eq.s32.totalorder %s982_s22, 1 }
  0xb0   : > { %v335_v9 = vld [vmem:[%s274_s9 + $0x8] sm:$0xff]  ;;  %s456_s28 = scalar_select %p453_p2, 1, 0 }
  0xb1   : > { %602 = vmatpush3.bf16.msra.mxu0 %v333_v5  ;;  %v592_v47 = vld [vmem:[%s282_s6] ss:$0 sm:$0xff]  ;;  %s469_s15 = sshll.u32 %s930_s13, 4  ;;  %s470_s15 = int_to_ptr.vmem [resolvable:$true] %s469_s15 }
  0xb2   : > { %v593_v50 = vld [vmem:[%s290_s17] ss:$0 sm:$0xff]  ;;  %v457_v53 = vstv %s456_s28  ;;  %s845_s25 = scalar_lea.vmem %s470_s15, 256  ;;  %p852_p5 = scmp.lt.s32.totalorder %s470_s15, %s470_s15 }
  0xb3   : > { %vm458_vm2 = vcmp.eq.s32.totalorder %v457_v53, 1  ;;  %p846_p7 = scmp.ne.s32.totalorder %s470_s15, %s845_s25  ;;  %p853_p13 = scmp.lt.s32.totalorder %s845_s25, %s845_s25 }
  0xb4   : > { %604 = vmatmul.mubr.msk.bf16.vlgmr.msra.gmra.mrb[0].mxu0 %vm341_vm1, %v692_v6 }
  0xb5   : > { %p847_p9 = pnand %p846_p7, %p647_p4  ;;  %p854_p11 = por %p853_p13, %p852_p5 }
  0xb7   : > { %p848_p8 = pneg %p847_p9 }
  0xb9   : > { %p855_p6 = pnand %p854_p11, %p848_p8 }
 0x187   : > { %v379_v8 = vpop.f32.mrb[0].mxu0 }
 0x188   : > { %v380_v10 = vadd.f32 %v379_v8, %v334_v7  ;;  %v605_v11 = vpop.f32.mrb[1].mxu0 }
 0x189   : > { %v382_v12 = vpop.f32.mrb[2].mxu0 }
 0x18a   : > { %v383_v13 = vadd.f32 %v382_v12, %v335_v9  ;;  %v606_v14 = vpop.f32.mrb[3].mxu0  ;;  %v386_v15 = vmul.f32 %v380_v10, %v380_v10 }
 0x18c   : > { %388 = vadd.xlane.f32.xlu0 %v386_v15  ;;  %v387_v16 = vmul.f32 %v383_v13, %v383_v13 }
 0x190   : > { %390 = vadd.xlane.f32.xlu0 %v387_v16 }
 0x219   : > { %v389_v17 = vpop.xlane.xlu0 %388 }
 0x21a   : > { %v392_v18 = vmax.f32 %v389_v17, 1e-24 }
 0x21c   : > { %693 = vrsqrt.f32 %v392_v18 }
 0x21d   : > { %v391_v19 = vpop.xlane.xlu0 %390 }
 0x21e   : > { %v393_v20 = vmax.f32 %v391_v19, 1e-24 }
 0x220   : > { %695 = vrsqrt.f32 %v393_v20 }
 0x226   : > { %v694_v21 = vpop.eup %693 }
 0x227   : > { %v396_v23 = vmul.f32 %v694_v21, %v380_v10 }
 0x22a   : > { %v696_v22 = vpop.eup %695 }
 0x22b   : > { %v397_v24 = vmul.f32 %v696_v22, %v383_v13 }
 0x22d   : > { %v409_v25 = vadd.f32 %v397_v24, %v396_v23 }
 0x22f   : > { %v410_v26 = vrot.slane %v409_v25, 4 }
 0x231   : > { %v411_v27 = vadd.f32 %v410_v26, %v409_v25 }
 0x233   : > { %v412_v28 = vrot.slane %v411_v27, 2 }
 0x235   : > { %v413_v29 = vadd.f32 %v412_v28, %v411_v27 }
 0x237   : > { %v414_v30 = vrot.slane %v413_v29, 1 }
 0x239   : > { %v415_v31 = vadd.f32 %v414_v30, %v413_v29 }
 0x23b   : > { %v416_v32 = vmul.f32 0.0625, %v415_v31 }
 0x23d   : > { %v417_v33 = vsub.f32 %v396_v23, %v416_v32  ;;  %v418_v34 = vsub.f32 %v397_v24, %v416_v32 }
 0x23f   : > { %v421_v35 = vmul.f32 %v417_v33, %v417_v33  ;;  %v422_v36 = vmul.f32 %v418_v34, %v418_v34 }
 0x241   : > { %v423_v37 = vadd.f32 %v422_v36, %v421_v35 }
 0x243   : > { %v424_v38 = vrot.slane %v423_v37, 4 }
 0x245   : > { %v425_v39 = vadd.f32 %v424_v38, %v423_v37 }
 0x247   : > { %v426_v40 = vrot.slane %v425_v39, 2 }
 0x249   : > { %v427_v41 = vadd.f32 %v426_v40, %v425_v39 }
 0x24b   : > { %v428_v42 = vrot.slane %v427_v41, 1 }
 0x24d   : > { %v429_v43 = vadd.f32 %v428_v42, %v427_v41 }
 0x24f   : > { %v430_v44 = vmul.f32 0.0625, %v429_v43 }
 0x251   : > { %v431_v45 = vadd.f32 1e-05, %v430_v44 }
 0x253   : > { %697 = vrsqrt.f32 %v431_v45 }
 0x25d   : > { %v698_v46 = vpop.eup %697 }
 0x25e   : > { %v434_v48 = vmul.f32 %v698_v46, %v418_v34  ;;  %v433_v49 = vmul.f32 %v698_v46, %v417_v33 }
 0x260   : > { %v442_v51 = vmul.f32 %v592_v47, %v433_v49  ;;  %v443_v52 = vmul.f32 %v592_v47, %v434_v48 }
 0x262   : > { %v451_v54 = vadd.f32 %v593_v50, %v442_v51  ;;  %v452_v55 = vadd.f32 %v593_v50, %v443_v52 }
 0x264   : > { %v454_v56 = vmax.f32 %v451_v54, 0.0  ;;  %v455_v57 = vmax.f32 %v452_v55, 0.0 }
 0x266   : > { %v459_v58 = vsel %vm458_vm2, %v454_v56, %v451_v54  ;;  %v460_v59 = vsel %vm458_vm2, %v455_v57, %v452_v55 }
 0x267   : > { %461 = vst [vmem:[#allocation10] sm:$0xff] %v459_v58  ;;  %462 = vst [vmem:[#allocation10 + $0x8] sm:$0xff] %v460_v59 }
 0x268   : > { %858 = shalt.err (!%p855_p6)
}
 0x269   : > { %s859_s27 = scalar_lea.hbm %s1243_s5, 256 }
 0x26a   : > { %p860_p10 = scmp.ne.s32.totalorder %s1243_s5, %s859_s27  ;;  %p865_p3 = scmp.lt.u32.totalorder %s859_s27, %s1243_s5 }
 0x26c   : > { %p861_p1 = pnand %p860_p10, %p647_p4 }
 0x26e   : > { %p862_p0 = pneg %p861_p1 }
 0x270   : > { %p867_p12 = pnand %p865_p3, %p862_p0 }
 0x272   : > { %870 = shalt.err (!%p867_p12)
}
 0x273   : > { %s931_s14 = smov 128   ;;  %s932_s21 = smov 8  }
 0x274   : > { %622 = dma.vmem_to_hbm [thread:$0]  (%p647_p4), %s470_s15, 256, %s1243_s5, [#allocation4], %s931_s14, %s931_s14, %s932_s21  }
 0x275   : > { %900 = dma.done.wait (%p647_p4), [#allocation4], 256  }
 0x276   : > { %902 = vsyncadd (%p647_p4), [#allocation4], 4294967040 }
 0x277 PF: > { %p15_p2 = scmp.ge.s32.totalorder %s985_s23, 4   ;;  %s1280_s18 = smov %s909_s19 }
 0x278   : > { %s1281_s19 = smov %s913_s20  ;;  %s1282_s20 = smov %s995_s26 }
 0x279   : > { %s1283_s21 = smov %s985_s23  ;;  %17 = sbr.rel (!%p15_p2) target bundleno = 6 (0x6), region = 110 }
 0x280   :  { %485 = vsyncpa [#allocation3], 1 }
 0x281   :  { %487 = vsyncpa [#allocation3 + $0x1], 1 }
 0x282   :  { %488 = vsyncpa [#allocation6], 1 }
 0x283   :  { %489 = vsyncpa [#allocation4], 1 }
 0x284   :  { %491 = vsyncpa [#allocation4 + $0x1], 1 }

</bundles_post_ra>
